<compile_context>
chip_gen: v7x
topology: tpu7x:2x2x1
jax: 0.10.0
libtpu: 0.0.40
codegen_flags: <defaults>
</compile_context>

<pallas_src>
import functools

import jax
import jax.numpy as jnp
from jax.experimental import pallas as pl
from jax.experimental.pallas import tpu as pltpu


def _triplet_loss_kernel(a_ref, p_ref, n_ref, out_ref, *,
                         margin, size_average, true_b, tile_b):
    step = pl.program_id(0)
    num_steps = pl.num_programs(0)

    # Init the resident scalar accumulator on the first grid step.
    @pl.when(step == 0)
    def _():
        out_ref[...] = jnp.zeros_like(out_ref)

    a = a_ref[...]
    p = p_ref[...]
    n = n_ref[...]

    # Subtract in the input dtype, upcast only the difference (keeps bf16
    # inputs cheap on the DMA side; exact for f32 inputs).
    dpos = (a - p).astype(jnp.float32)
    dneg = (a - n).astype(jnp.float32)

    # Per-row L2 distances, kept 2-D as (TB, 1) for a dense sublane layout.
    dist_p = jnp.sqrt(jnp.sum(dpos * dpos, axis=1, keepdims=True))
    dist_n = jnp.sqrt(jnp.sum(dneg * dneg, axis=1, keepdims=True))

    losses = jnp.maximum(dist_p - dist_n + jnp.float32(margin), 0.0)  # (TB, 1)

    # Mask rows past the true batch size (remainder tile): padded rows would
    # otherwise contribute relu(margin) > 0 (and possibly NaN from garbage).
    row_ids = step * tile_b + jax.lax.broadcasted_iota(jnp.int32, (tile_b, 1), 0)
    losses = jnp.where(row_ids < true_b, losses, 0.0)

    out_ref[...] += jnp.sum(losses, axis=0, keepdims=True)

    if size_average:
        @pl.when(step == num_steps - 1)
        def _():
            out_ref[...] = out_ref[...] / jnp.float32(true_b)


def _choose_tile_rows(B, D, dtype):
    """Pick a row-tile size: ~2 MiB per input tile, multiple of 8, capped at B."""
    itemsize = jnp.dtype(dtype).itemsize
    target_bytes = 2 * 1024 * 1024
    tb = max(8, (target_bytes // max(D * itemsize, 1)) // 8 * 8)
    if B <= tb:
        # Single full-batch block (block_shape equal to the full array dim is
        # always a legal layout, even if B is not a multiple of 8).
        return B
    return int(tb)


def triplet_loss(anchor, positive, negative, *, margin, size_average=True,
                 tile_rows=None):
    """Pallas TPU implementation of TripletLoss.forward.

    anchor/positive/negative: (B, D) float arrays (f32 or bf16).
    Returns a scalar float32.
    """
    assert anchor.shape == positive.shape == negative.shape
    assert anchor.dtype == positive.dtype == negative.dtype
    B, D = anchor.shape

    tb = _choose_tile_rows(B, D, anchor.dtype) if tile_rows is None else int(tile_rows)
    if tb >= B:
        tb = B
    else:
        tb = max(8, (tb // 8) * 8)          # rows must be a multiple of 8 when tiling
    grid = (pl.cdiv(B, tb),)

    kernel = functools.partial(
        _triplet_loss_kernel,
        margin=float(margin),
        size_average=bool(size_average),
        true_b=int(B),
        tile_b=int(tb),
    )

    emb_spec = pl.BlockSpec((tb, D), lambda i: (i, 0))

    out = pl.pallas_call(
        kernel,
        out_shape=jax.ShapeDtypeStruct((1, 1), jnp.float32),
        grid=grid,
        in_specs=[emb_spec, emb_spec, emb_spec],
        out_specs=pl.BlockSpec((1, 1), lambda i: (0, 0)),
        compiler_params=pltpu.CompilerParams(
            dimension_semantics=("arbitrary",)),
    )(anchor, positive, negative)

    return out[0, 0]


def triplet_loss_ref(anchor, positive, negative, *, margin, size_average=True):
    """Pure-JAX reference mirroring the PyTorch forward exactly."""
    a = anchor.astype(jnp.float32)
    p = positive.astype(jnp.float32)
    n = negative.astype(jnp.float32)
    dp = jnp.sqrt(jnp.sum((a - p) ** 2, axis=1))
    dn = jnp.sqrt(jnp.sum((a - n) ** 2, axis=1))
    losses = jax.nn.relu(dp - dn + margin)
    return jnp.mean(losses) if size_average else jnp.sum(losses)


if __name__ == "__main__":
    # TripletLoss has no learnable parameters; only `margin` from __init__.
    margin = 0.5

    key = jax.random.PRNGKey(0)

    # --- small "toy" batch: single full block ---
    B, D = 8, 32
    ka, kp, kn = jax.random.split(key, 3)
    anchor = jax.random.normal(ka, (B, D), dtype=jnp.float32)
    positive = jax.random.normal(kp, (B, D), dtype=jnp.float32)
    negative = jax.random.normal(kn, (B, D), dtype=jnp.float32)

    out_mean = triplet_loss(anchor, positive, negative,
                            margin=margin, size_average=True)
    out_sum = triplet_loss(anchor, positive, negative,
                           margin=margin, size_average=False)
    jax.block_until_ready(out_mean)
    jax.block_until_ready(out_sum)

    ref_mean = triplet_loss_ref(anchor, positive, negative,
                                margin=margin, size_average=True)
    ref_sum = triplet_loss_ref(anchor, positive, negative,
                               margin=margin, size_average=False)
    assert jnp.allclose(out_mean, ref_mean, atol=1e-5, rtol=1e-5)
    assert jnp.allclose(out_sum, ref_sum, atol=1e-5, rtol=1e-5)

    # --- ragged batch with a forced small tile: exercises the multi-step
    #     grid, the resident accumulator and the remainder-row masking ---
    B2, D2 = 20, 32
    ka2, kp2, kn2 = jax.random.split(jax.random.PRNGKey(1), 3)
    anchor2 = jax.random.normal(ka2, (B2, D2), dtype=jnp.float32)
    positive2 = jax.random.normal(kp2, (B2, D2), dtype=jnp.float32)
    negative2 = jax.random.normal(kn2, (B2, D2), dtype=jnp.float32)

    out_mean2 = triplet_loss(anchor2, positive2, negative2,
                             margin=margin, size_average=True, tile_rows=8)
    out_sum2 = triplet_loss(anchor2, positive2, negative2,
                            margin=margin, size_average=False, tile_rows=8)
    jax.block_until_ready(out_mean2)
    jax.block_until_ready(out_sum2)

    ref_mean2 = triplet_loss_ref(anchor2, positive2, negative2,
                                 margin=margin, size_average=True)
    ref_sum2 = triplet_loss_ref(anchor2, positive2, negative2,
                                margin=margin, size_average=False)
    assert jnp.allclose(out_mean2, ref_mean2, atol=1e-5, rtol=1e-5)
    assert jnp.allclose(out_sum2, ref_sum2, atol=1e-5, rtol=1e-5)

    print("KERNEL_OK")
</pallas_src>

<mosaic_0001>
module attributes {stable_mosaic.version = 11 : i64} {
  func.func @_triplet_loss_kernel(%arg0: i32, %arg1: memref<8x32xf32, #tpu.memory_space<vmem>>, %arg2: memref<8x32xf32, #tpu.memory_space<vmem>>, %arg3: memref<8x32xf32, #tpu.memory_space<vmem>>, %arg4: memref<1x1xf32, #tpu.memory_space<vmem>>) attributes {dimension_semantics = [#tpu.dimension_semantics<arbitrary>], iteration_bounds = array<i64: 1>, scalar_prefetch = 0 : i64, scratch_operands = 0 : i64, tpu.core_type = #tpu.core_type<tc>, window_params = [{transform_indices = @transform_0, window_bounds = array<i64: 8, 32>}, {transform_indices = @transform_1, window_bounds = array<i64: 8, 32>}, {transform_indices = @transform_2, window_bounds = array<i64: 8, 32>}, {pipeline_mode = #tpu.pipeline_mode<synchronous>, transform_indices = @transform_3, window_bounds = array<i64: 1, 1>}]} {
    %c0_i32 = arith.constant 0 : i32
    %0 = arith.cmpi eq, %arg0, %c0_i32 : i32
    %1 = arith.extui %0 : i1 to i32
    %c0_i32_0 = arith.constant 0 : i32
    %2 = arith.cmpi ne, %1, %c0_i32_0 : i32
    scf.if %2 {
      %cst_18 = arith.constant 0.000000e+00 : f32
      %37 = vector.broadcast %cst_18 : f32 to vector<1x1xf32>
      %c0_19 = arith.constant 0 : index
      %c0_20 = arith.constant 0 : index
      %38 = vector.load %arg4[%c0_19, %c0_20] : memref<1x1xf32, #tpu.memory_space<vmem>>, vector<1x1xf32>
      tpu.vector_store %arg4[%c0_19, %c0_20], %37 {strides = array<i32>} : memref<1x1xf32, #tpu.memory_space<vmem>>, vector<1x1xf32>,
    } else {
    }
    %c0 = arith.constant 0 : index
    %c0_1 = arith.constant 0 : index
    %3 = vector.load %arg1[%c0, %c0_1] : memref<8x32xf32, #tpu.memory_space<vmem>>, vector<8x32xf32>
    %c0_2 = arith.constant 0 : index
    %c0_3 = arith.constant 0 : index
    %4 = vector.load %arg2[%c0_2, %c0_3] : memref<8x32xf32, #tpu.memory_space<vmem>>, vector<8x32xf32>
    %c0_4 = arith.constant 0 : index
    %c0_5 = arith.constant 0 : index
    %5 = vector.load %arg3[%c0_4, %c0_5] : memref<8x32xf32, #tpu.memory_space<vmem>>, vector<8x32xf32>
    %6 = arith.subf %3, %4 : vector<8x32xf32>
    %7 = arith.subf %3, %5 : vector<8x32xf32>
    %8 = arith.mulf %6, %6 : vector<8x32xf32>
    %cst = arith.constant dense<0.000000e+00> : vector<8xf32>
    %9 = vector.multi_reduction <add>, %8, %cst [1] : vector<8x32xf32> to vector<8xf32>
    %10 = vector.shape_cast %9 : vector<8xf32> to vector<8x1xf32>
    %11 = math.sqrt %10 : vector<8x1xf32>
    %12 = arith.mulf %7, %7 : vector<8x32xf32>
    %cst_6 = arith.constant dense<0.000000e+00> : vector<8xf32>
    %13 = vector.multi_reduction <add>, %12, %cst_6 [1] : vector<8x32xf32> to vector<8xf32>
    %14 = vector.shape_cast %13 : vector<8xf32> to vector<8x1xf32>
    %15 = math.sqrt %14 : vector<8x1xf32>
    %16 = arith.subf %11, %15 : vector<8x1xf32>
    %cst_7 = arith.constant 5.000000e-01 : f32
    %17 = vector.broadcast %cst_7 : f32 to vector<8x1xf32>
    %18 = arith.addf %16, %17 : vector<8x1xf32>
    %cst_8 = arith.constant 0.000000e+00 : f32
    %19 = vector.broadcast %cst_8 : f32 to vector<8x1xf32>
    %20 = arith.maximumf %18, %19 : vector<8x1xf32>
    %c8_i32 = arith.constant 8 : i32
    %21 = arith.muli %arg0, %c8_i32 : i32
    %22 = tpu.iota {dimensions = array<i32: 0>} : vector<8x1xi32>
    %23 = vector.broadcast %21 : i32 to vector<8x1xi32>
    %24 = arith.addi %23, %22 : vector<8x1xi32>
    %c8_i32_9 = arith.constant 8 : i32
    %25 = vector.broadcast %c8_i32_9 : i32 to vector<8x1xi32>
    %26 = arith.cmpi slt, %24, %25 : vector<8x1xi32>
    %cst_10 = arith.constant 0.000000e+00 : f32
    %27 = vector.broadcast %cst_10 : f32 to vector<8x1xf32>
    %28 = arith.select %26, %20, %27 : vector<8x1xi1>, vector<8x1xf32>
    %c0_11 = arith.constant 0 : index
    %c0_12 = arith.constant 0 : index
    %29 = vector.load %arg4[%c0_11, %c0_12] : memref<1x1xf32, #tpu.memory_space<vmem>>, vector<1x1xf32>
    %cst_13 = arith.constant dense<0.000000e+00> : vector<1xf32>
    %30 = vector.multi_reduction <add>, %28, %cst_13 [0] : vector<8x1xf32> to vector<1xf32>
    %31 = vector.shape_cast %30 : vector<1xf32> to vector<1x1xf32>
    %32 = arith.addf %29, %31 : vector<1x1xf32>
    %c0_14 = arith.constant 0 : index
    %c0_15 = arith.constant 0 : index
    %33 = vector.load %arg4[%c0_14, %c0_15] : memref<1x1xf32, #tpu.memory_space<vmem>>, vector<1x1xf32>
    tpu.vector_store %arg4[%c0_14, %c0_15], %32 {strides = array<i32>} : memref<1x1xf32, #tpu.memory_space<vmem>>, vector<1x1xf32>,
    %c0_i32_16 = arith.constant 0 : i32
    %34 = arith.cmpi eq, %arg0, %c0_i32_16 : i32
    %35 = arith.extui %34 : i1 to i32
    %c0_i32_17 = arith.constant 0 : i32
    %36 = arith.cmpi ne, %35, %c0_i32_17 : i32
    scf.if %36 {
      %c0_18 = arith.constant 0 : index
      %c0_19 = arith.constant 0 : index
      %37 = vector.load %arg4[%c0_18, %c0_19] : memref<1x1xf32, #tpu.memory_space<vmem>>, vector<1x1xf32>
      %cst_20 = arith.constant 8.000000e+00 : f32
      %38 = vector.broadcast %cst_20 : f32 to vector<1x1xf32>
      %39 = arith.divf %37, %38 : vector<1x1xf32>
      %c0_21 = arith.constant 0 : index
      %c0_22 = arith.constant 0 : index
      %40 = vector.load %arg4[%c0_21, %c0_22] : memref<1x1xf32, #tpu.memory_space<vmem>>, vector<1x1xf32>
      tpu.vector_store %arg4[%c0_21, %c0_22], %39 {strides = array<i32>} : memref<1x1xf32, #tpu.memory_space<vmem>>, vector<1x1xf32>,
    } else {
    }
    return
  }
  func.func @transform_0(%arg0: i32) -> (i32, i32) {
    %c0_i32 = arith.constant 0 : i32
    %c0_i32_0 = arith.constant 0 : i32
    return %arg0, %c0_i32 : i32, i32
  }
  func.func @transform_1(%arg0: i32) -> (i32, i32) {
    %c0_i32 = arith.constant 0 : i32
    %c0_i32_0 = arith.constant 0 : i32
    return %arg0, %c0_i32 : i32, i32
  }
  func.func @transform_2(%arg0: i32) -> (i32, i32) {
    %c0_i32 = arith.constant 0 : i32
    %c0_i32_0 = arith.constant 0 : i32
    return %arg0, %c0_i32 : i32, i32
  }
  func.func @transform_3(%arg0: i32) -> (i32, i32) {
    %c0_i32 = arith.constant 0 : i32
    %c0_i32_0 = arith.constant 0 : i32
    %c0_i32_1 = arith.constant 0 : i32
    return %c0_i32, %c0_i32_0 : i32, i32
  }
}

</mosaic_0001>

<bundles_post_ra>
// kernel: tpu_custom_call.1
= control target key start
LH: loop header
LB: loop body
LE: loop exit
PB: predicated region body
PF: predicated region fallthrough
CT: control target
= control target key end

     0   :  { %8 = vsyncpa [#allocation3], 0  ;;  %s306_s0 = inlined_call_operand.hbm [shape: f32[8,32], index: 0, kind: input, shape index: {}]   ;;  %s307_s1 = inlined_call_operand.hbm [shape: f32[8,32], index: 1, kind: input, shape index: {}]   ;;  %s308_s2 = inlined_call_operand.hbm [shape: f32[8,32], index: 2, kind: input, shape index: {}]   ;;  %s309_s3 = inlined_call_operand.hbm [shape: f32[1,1], index: 3, kind: output, shape index: {}]  }
   0x1   :  { %9 = vsyncpa [#allocation6], 0 }
   0x2   :  { %10 = vsyncpa [#allocation4], 0  ;;  %s230_s12 = smov [#allocation5]   ;;  %s231_s14 = smov [#allocation2]  }
   0x3   :  { %s27_s13 = sshll.u32 %s230_s12, 4  ;;  %s17_s15 = sshll.u32 %s231_s14, 4  ;;  %s28_s13 = int_to_ptr.vmem [resolvable:$true] %s27_s13  ;;  %s18_s15 = int_to_ptr.vmem [resolvable:$true] %s17_s15 }
   0x4   :  { %s136_s18 = scalar_lea.hbm %s307_s1, 128 }
   0x5   :  { %p137_p0 = scmp.ne.s32.totalorder %s307_s1, %s136_s18  ;;  %p140_p1 = scmp.lt.u32.totalorder %s136_s18, %s307_s1 }
   0x7   :  { %p142_p2 = pnand %p140_p1, %p137_p0 }
   0x9   :  { %145 = shalt.err (!%p142_p2)
}
   0xa   :  { %s146_s23 = scalar_lea.vmem %s28_s13, 128  ;;  %p151_p4 = scmp.lt.s32.totalorder %s28_s13, %s28_s13 }
   0xb   :  { %p147_p3 = scmp.ne.s32.totalorder %s28_s13, %s146_s23  ;;  %p152_p5 = scmp.lt.s32.totalorder %s146_s23, %s146_s23 }
   0xd   :  { %p153_p6 = por %p152_p5, %p151_p4 }
   0xf   :  { %p154_p7 = pnand %p153_p6, %p147_p3 }
  0x11   :  { %157 = shalt.err (!%p154_p7)
}
  0x12   :  { %30 = dma.hbm_to_vmem [thread:$0]  %s307_s1, 128, %s28_s13, [#allocation6]  }
  0x13   :  { %s158_s28 = scalar_lea.hbm %s306_s0, 128 }
  0x14   :  { %p159_p8 = scmp.ne.s32.totalorder %s306_s0, %s158_s28  ;;  %p162_p9 = scmp.lt.u32.totalorder %s158_s28, %s306_s0 }
  0x16   :  { %p164_p10 = pnand %p162_p9, %p159_p8 }
  0x18   :  { %167 = shalt.err (!%p164_p10)
}
  0x19   :  { %s168_s6 = scalar_lea.vmem %s18_s15, 128  ;;  %p173_p12 = scmp.lt.s32.totalorder %s18_s15, %s18_s15 }
  0x1a   :  { %p169_p11 = scmp.ne.s32.totalorder %s18_s15, %s168_s6  ;;  %p174_p13 = scmp.lt.s32.totalorder %s168_s6, %s168_s6 }
  0x1c   :  { %p175_p0 = por %p174_p13, %p173_p12 }
  0x1e   :  { %p176_p1 = pnand %p175_p0, %p169_p11 }
  0x20   :  { %179 = shalt.err (!%p176_p1)
}
  0x21   :  { %20 = dma.hbm_to_vmem [thread:$0]  %s306_s0, 128, %s18_s15, [#allocation3]  }
  0x22   :  { %s232_s8 = smov [#allocation7]   ;;  %s180_s12 = scalar_lea.hbm %s308_s2, 128 }
  0x23   :  { %s37_s9 = sshll.u32 %s232_s8, 4  ;;  %p181_p2 = scmp.ne.s32.totalorder %s308_s2, %s180_s12  ;;  %s38_s9 = int_to_ptr.vmem [resolvable:$true] %s37_s9 }
  0x24   :  { %p184_p3 = scmp.lt.u32.totalorder %s180_s12, %s308_s2 }
  0x26   :  { %p186_p4 = pnand %p184_p3, %p181_p2 }
  0x28   :  { %189 = shalt.err (!%p186_p4)
}
  0x29   :  { %s190_s18 = scalar_lea.vmem %s38_s9, 128  ;;  %p195_p6 = scmp.lt.s32.totalorder %s38_s9, %s38_s9 }
  0x2a   :  { %p191_p5 = scmp.ne.s32.totalorder %s38_s9, %s190_s18  ;;  %p196_p7 = scmp.lt.s32.totalorder %s190_s18, %s190_s18 }
  0x2c   :  { %p197_p8 = por %p196_p7, %p195_p6 }
  0x2e   :  { %p198_p9 = pnand %p197_p8, %p191_p5 }
  0x30   :  { %201 = shalt.err (!%p198_p9)
}
  0x31   :  { %40 = dma.hbm_to_vmem [thread:$0]  %s308_s2, 128, %s38_s9, [#allocation6]  }
  0x32   :  { %224 = dma.done.wait [#allocation3], 128  }
  0x33   :  { %225 = vsyncadd [#allocation3], 4294967168 }
  0x34   :  { %226 = dma.done.wait [#allocation6], 256  }
  0x35   :  { %227 = vsyncadd [#allocation6], 4294967040  ;;  %v56_v0 = vld [vmem:[#allocation2] sm:$0xff]  ;;  %v57_v1 = vld [vmem:[#allocation5] sm:$0xff]  ;;  %vm62_vm0 = vcmask 261120   ;;  %vm54_vm1 = vcmask 0  }
  0x36   :  { %v58_v2 = vld [vmem:[#allocation7] sm:$0xff]  ;;  %v59_v3 = vsub.f32 %v56_v0, %v57_v1  ;;  %v233_v9 = vmov 0.0   ;;  %s234_s2 = smov [#allocation8]  }
  0x37   :  { %v60_v4 = vsub.f32 %v56_v0, %v58_v2  ;;  %55 = vst.msk [vmem:[#allocation8] sm:$0x1] %vm54_vm1, %v233_v9  ;;  %s117_s19 = sshll.u32 %s234_s2, 4  ;;  %s118_s19 = int_to_ptr.vmem [resolvable:$true] %s117_s19 }
  0x38   :  { %v61_v5 = vmul.f32 %v59_v3, %v59_v3  ;;  %s202_s20 = scalar_lea.vmem %s118_s19, 16  ;;  %s206_s21 = scalar_lea.vmem %s118_s19, 32 }
  0x39   :  { %v73_v6 = vmul.f32 %v60_v4, %v60_v4  ;;  %p203_p10 = scmp.ne.s32.totalorder %s118_s19, %s202_s20  ;;  %p207_p11 = scmp.lt.s32.totalorder %s118_s19, %s118_s19 }
  0x3a   :  { %v63_v7 = vsel %vm62_vm0, %v61_v5, 0.0  ;;  %p208_p12 = scmp.lt.s32.totalorder %s206_s21, %s202_s20 }
  0x3b   :  { %64 = vadd.xlane.f32.xlu0 %v63_v7  ;;  %v74_v8 = vsel %vm62_vm0, %v73_v6, 0.0 }
  0x3c   :  { %p209_p13 = por %p208_p12, %p207_p11 }
  0x3e   :  { %v94_v30 = vld [vmem:[#allocation8] sm:$0x1]  ;;  %p210_p0 = pnand %p209_p13, %p203_p10 }
  0x3f   :  { %75 = vadd.xlane.f32.xlu0 %v74_v8 }
  0xc8   :  { %v65_v10 = vpop.xlane.xlu0 %64 }
  0xc9   :  { %132 = vrsqrt.f32 %v65_v10  ;;  %vm68_vm2 = vcmp.eq.f32.partialorder %v65_v10, inf  ;;  %v71_v17 = vand.u32 2147483648, %v65_v10  ;;  %vm70_vm4 = vcmp.eq.f32.partialorder %v65_v10, 0.0 }
  0xcc   :  { %v76_v11 = vpop.xlane.xlu0 %75 }
  0xcd   :  { %134 = vrsqrt.f32 %v76_v11  ;;  %vm79_vm3 = vcmp.eq.f32.partialorder %v76_v11, inf  ;;  %v82_v18 = vand.u32 2147483648, %v76_v11  ;;  %vm81_vm5 = vcmp.eq.f32.partialorder %v76_v11, 0.0 }
  0xd3   :  { %v133_v12 = vpop.eup %132 }
  0xd4   :  { %v67_v13 = vmul.f32 %v133_v12, %v65_v10 }
  0xd6   :  { %v69_v15 = vsel %vm68_vm2, %v65_v10, %v67_v13 }
  0xd7   :  { %v135_v14 = vpop.eup %134  ;;  %v72_v20 = vsel %vm70_vm4, %v71_v17, %v69_v15 }
  0xd8   :  { %v78_v16 = vmul.f32 %v135_v14, %v76_v11 }
  0xda   :  { %v80_v19 = vsel %vm79_vm3, %v76_v11, %v78_v16 }
  0xdb   :  { %v83_v21 = vsel %vm81_vm5, %v82_v18, %v80_v19 }
  0xdc   :  { %v84_v22 = vsub.f32 %v72_v20, %v83_v21 }
  0xde   :  { %v85_v23 = vadd.f32 0.5, %v84_v22 }
  0xe0   :  { %v86_v24 = vmax.f32 %v85_v23, 0.0 }
  0xe2   :  { %v95_v25 = vrot.slane %v86_v24, 4 }
  0xe4   :  { %v96_v26 = vadd.f32 %v95_v25, %v86_v24 }
  0xe6   :  { %v97_v27 = vrot.slane %v96_v26, 2 }
  0xe8   :  { %v98_v28 = vadd.f32 %v97_v27, %v96_v26 }
  0xea   :  { %v99_v29 = vrot.slane %v98_v28, 1 }
  0xec   :  { %v100_v31 = vadd.f32 %v99_v29, %v98_v28 }
  0xee   :  { %v101_v32 = vadd.f32 %v100_v31, %v94_v30 }
  0xf0   :  { %103 = vst.msk [vmem:[#allocation8] sm:$0x1] %vm54_vm1, %v101_v32 }
  0xf7   :  { %v107_v33 = vld [vmem:[#allocation8] sm:$0x1] }
  0xf8   :  { %v109_v34 = vmul.f32 0.125, %v107_v33 }
  0xfa   :  { %110 = vst.msk [vmem:[#allocation8] sm:$0x1] %vm54_vm1, %v109_v34 }
  0xfb   :  { %213 = shalt.err (!%p210_p0)
}
  0xfc   :  { %s214_s24 = scalar_lea.hbm %s309_s3, 16 }
  0xfd   :  { %p215_p1 = scmp.ne.s32.totalorder %s309_s3, %s214_s24  ;;  %p218_p2 = scmp.lt.u32.totalorder %s214_s24, %s309_s3 }
  0xff   :  { %p220_p3 = pnand %p218_p2, %p215_p1 }
 0x101   :  { %223 = shalt.err (!%p220_p3)
}
 0x102   :  { %120 = dma.vmem_to_hbm [thread:$0]  %s118_s19, 16, %s309_s3, [#allocation4]  }
 0x103   :  { %228 = dma.done.wait [#allocation4], 16  }
 0x104   :  { %229 = vsyncadd [#allocation4], 4294967280 }
 0x105   :  { %124 = vsyncpa [#allocation3], 1 }
 0x106   :  { %125 = vsyncpa [#allocation6], 1 }
 0x107   :  { %126 = vsyncpa [#allocation4], 1 }

</bundles_post_ra>
